<compile_context>
chip_gen: v7x
topology: tpu7x:2x2x1
jax: 0.10.0
libtpu: 0.0.40
codegen_flags: <defaults>
</compile_context>

<pallas_src>
import jax
import jax.numpy as jnp
from jax.experimental import pallas as pl
from jax.experimental.pallas import tpu as pltpu


def _round_up(a, m):
    return (a + m - 1) // m * m


# ---------------------------------------------------------------------------
# Kernels
# ---------------------------------------------------------------------------
def _highway_math(x_mxu, x_res, w, b, o_ref):
    tn = o_ref.shape[-1]
    # One fused MXU pass: (tb, H_pad) @ (H_pad, 2*tn) -> (tb, 2*tn), f32 accum.
    h = jnp.dot(x_mxu, w, preferred_element_type=jnp.float32) + b
    t = jax.nn.sigmoid(h[:, :tn])        # gate      (fc1 half)
    g = jnp.maximum(h[:, tn:], 0.0)      # relu(fc2) (fc2 half)
    # x + t * (g - x)  ==  t*g + (1-t)*x, one fewer multiply.
    o_ref[...] = (x_res + t * (g - x_res)).astype(o_ref.dtype)


def _highway_kernel_shared_x(x_ref, w_ref, b_ref, o_ref):
    # Matmul-stream dtype == x dtype: residual is an in-kernel, lane-aligned
    # column slice of the already-resident x tile (no second HBM stream).
    tn = o_ref.shape[-1]
    off = pl.multiple_of(pl.program_id(0) * tn, tn)
    _highway_math(x_ref[...], x_ref[:, pl.ds(off, tn)], w_ref[...], b_ref[...], o_ref)


def _highway_kernel_split_x(x_ref, xres_ref, w_ref, b_ref, o_ref):
    # Matmul stream pre-cast to the MXU dtype in the wrapper; residual kept in
    # x's original dtype as a narrow (block_b, block_n) column-slice stream.
    _highway_math(x_ref[...], xres_ref[...], w_ref[...], b_ref[...], o_ref)


# ---------------------------------------------------------------------------
# Tiling choices
# ---------------------------------------------------------------------------
def choose_block_n(H, max_block_n=None):
    """Largest 128-multiple divisor of round_up(H, 128) that is <= max_block_n."""
    H_pad = _round_up(H, 128)
    if max_block_n is None:
        # Keep weight tile small enough for v7x's 64 MiB VMEM at very large H.
        max_block_n = 256 if H_pad >= 8192 else 512
    bn = 128
    for cand in range(128, min(H_pad, max_block_n) + 1, 128):
        if H_pad % cand == 0:
            bn = cand
    return bn


def _choose_block_b(B):
    """Multiple-of-8 batch tile; prefer a divisor of round_up(B, 8) (no pad copy)."""
    B8 = _round_up(B, 8)
    for cand in range(min(256, B8), 7, -8):
        if B8 % cand == 0:
            if cand >= 64 or B8 <= 256:
                return cand
            break
    return min(256, B8)  # fall back to padding B up to a multiple of 256


# ---------------------------------------------------------------------------
# One-time parameter packing (PyTorch Linear stores W as (out, in))
# ---------------------------------------------------------------------------
def prepare_highway_params(w1, b1, w2, b2, *, block_n, mxu_dtype=jnp.bfloat16):
    """Pack PyTorch-layout params into the fused kernel layout (run once).

    Returns:
      w_f: (H_pad, 2*H_pad) mxu_dtype, column blocks of width 2*block_n laid
           out as [w1_cols_j | w2_cols_j] for hidden tile j.
      b_f: (1, 2*H_pad) float32, same block layout.
    H is zero-padded up to a multiple of block_n (block_n % 128 == 0).
    """
    H = w1.shape[0]
    assert block_n % 128 == 0, "block_n must be a multiple of 128"
    H_pad = _round_up(H, block_n)
    nj = H_pad // block_n
    pad = H_pad - H

    def pack_w(w):  # (out, in) -> transposed (in, out), zero-padded
        wt = jnp.asarray(w, jnp.float32).T
        return jnp.pad(wt, ((0, pad), (0, pad)))

    def pack_b(b):
        return jnp.pad(jnp.asarray(b, jnp.float32), (0, pad))

    w1_t = pack_w(w1).reshape(H_pad, nj, block_n)
    w2_t = pack_w(w2).reshape(H_pad, nj, block_n)
    w_f = jnp.concatenate([w1_t, w2_t], axis=2).reshape(H_pad, 2 * H_pad).astype(mxu_dtype)
    b_f = jnp.concatenate(
        [pack_b(b1).reshape(nj, block_n), pack_b(b2).reshape(nj, block_n)],
        axis=1,
    ).reshape(1, 2 * H_pad)
    return w_f, b_f


# ---------------------------------------------------------------------------
# Wrapper
# ---------------------------------------------------------------------------
def highway(x, w_f, b_f, *, block_n, block_b=None, out_dtype=None, vmem_limit_bytes=None):
    """x: (B, H).  (w_f, b_f) from prepare_highway_params(block_n=block_n)."""
    B, H = x.shape
    H_pad = w_f.shape[0]
    assert w_f.shape == (H_pad, 2 * H_pad) and b_f.shape == (1, 2 * H_pad)
    assert H <= H_pad and H_pad % block_n == 0
    nj = H_pad // block_n

    mxu_dtype = w_f.dtype
    x_dtype = x.dtype
    out_dtype = x_dtype if out_dtype is None else out_dtype
    separate_residual = mxu_dtype != x_dtype

    if block_b is None:
        block_b = _choose_block_b(B)
    B_pad = _round_up(B, block_b)
    nb = B_pad // block_b

    # Single pad (rows + cols) only if needed; residual stays in x's dtype.
    if B_pad != B or H_pad != H:
        x_res_p = jnp.pad(x, ((0, B_pad - B), (0, H_pad - H)))
    else:
        x_res_p = x
    # Cast the matmul operand to the MXU dtype ONCE (not per grid step).
    x_mxu_p = x_res_p.astype(mxu_dtype) if separate_residual else x_res_p

    itm = jnp.dtype(mxu_dtype).itemsize
    itx = jnp.dtype(x_dtype).itemsize
    ito = jnp.dtype(out_dtype).itemsize

    # j (hidden/weight tile) is the OUTER grid axis so the single-buffered
    # weight tile stays VMEM-resident across all batch tiles of a slab.
    grid = (nj, nb)
    out_spec = pl.BlockSpec((block_b, block_n), lambda j, i: (i, j))
    w_spec = pl.BlockSpec((H_pad, 2 * block_n), lambda j, i: (0, j),
                          pipeline_mode=pl.Buffered(1))
    b_spec = pl.BlockSpec((1, 2 * block_n), lambda j, i: (0, j),
                          pipeline_mode=pl.Buffered(1))
    x_spec = pl.BlockSpec((block_b, H_pad), lambda j, i: (i, 0))

    if separate_residual:
        kernel = _highway_kernel_split_x
        in_specs = [x_spec,
                    pl.BlockSpec((block_b, block_n), lambda j, i: (i, j)),  # residual cols
                    w_spec, b_spec]
        args = (x_mxu_p, x_res_p, w_f, b_f)
    else:
        kernel = _highway_kernel_shared_x
        in_specs = [x_spec, w_spec, b_spec]
        args = (x_mxu_p, w_f, b_f)

    # Always set a VMEM budget derived from the actual per-step footprint.
    if vmem_limit_bytes is None:
        fp = 2 * block_b * H_pad * itm                    # x stream, double-buffered
        if separate_residual:
            fp += 2 * block_b * block_n * itx             # residual stream
        fp += H_pad * 2 * block_n * itm                   # weights, single-buffered
        fp += 2 * block_n * 4                             # bias
        fp += 2 * block_b * block_n * ito                 # output, double-buffered
        fp += 6 * block_b * block_n * 4                   # h/t/g f32 temporaries
        vmem_limit_bytes = max(int(fp * 1.5) + (4 << 20), 32 << 20)

    # Shard the hidden-tile axis across TensorCores when it exists (keeps total
    # weight HBM traffic constant on v7x); otherwise shard the batch axis.
    dims = ("parallel", "arbitrary") if nj > 1 else ("arbitrary", "parallel")

    bytes_accessed = (nj * B_pad * H_pad * itm                 # x re-read per j slab
                      + (B_pad * H_pad * itx if separate_residual else 0)
                      + H_pad * 2 * H_pad * itm + 2 * H_pad * 4
                      + B_pad * H_pad * ito)
    cost = pl.CostEstimate(flops=int(4 * B_pad * H_pad * H_pad),
                           transcendentals=int(B_pad * H_pad),
                           bytes_accessed=int(bytes_accessed))

    out = pl.pallas_call(
        kernel,
        out_shape=jax.ShapeDtypeStruct((B_pad, H_pad), out_dtype),
        grid_spec=pltpu.PrefetchScalarGridSpec(
            num_scalar_prefetch=0,
            grid=grid,
            in_specs=in_specs,
            out_specs=out_spec,
        ),
        compiler_params=pltpu.CompilerParams(
            dimension_semantics=dims,
            vmem_limit_bytes=vmem_limit_bytes,
        ),
        cost_estimate=cost,
    )(*args)

    if B_pad != B or H_pad != H:
        out = out[:B, :H]
    return out


# ---------------------------------------------------------------------------
# Pure-JAX references
# ---------------------------------------------------------------------------
def highway_ref(x, w1, b1, w2, b2):
    t = jax.nn.sigmoid(x @ w1.T + b1)
    return t * jnp.maximum(x @ w2.T + b2, 0.0) + (1.0 - t) * x


def highway_ref_bf16(x, w1, b1, w2, b2):
    xb = x.astype(jnp.bfloat16)
    h1 = jnp.dot(xb, w1.T.astype(jnp.bfloat16), preferred_element_type=jnp.float32) + b1
    h2 = jnp.dot(xb, w2.T.astype(jnp.bfloat16), preferred_element_type=jnp.float32) + b2
    t = jax.nn.sigmoid(h1)
    return t * jnp.maximum(h2, 0.0) + (1.0 - t) * x


if __name__ == "__main__":
    key = jax.random.PRNGKey(0)

    def make_params(k, H):
        k1, kb1, k2, kb2 = jax.random.split(k, 4)
        bound = 1.0 / jnp.sqrt(H)
        w1 = jax.random.uniform(k1, (H, H), minval=-bound, maxval=bound, dtype=jnp.float32)
        b1 = jax.random.uniform(kb1, (H,), minval=-bound, maxval=bound, dtype=jnp.float32)
        w2 = jax.random.uniform(k2, (H, H), minval=-bound, maxval=bound, dtype=jnp.float32)
        b2 = jax.random.uniform(kb2, (H,), minval=-bound, maxval=bound, dtype=jnp.float32)
        return w1, b1, w2, b2

    # --- Test 1: module-default small shape (B=8, H=32); f32 and bf16 MXU paths.
    kx, kp = jax.random.split(key)
    B, H = 8, 32
    x = jax.random.normal(kx, (B, H), dtype=jnp.float32)
    w1, b1, w2, b2 = make_params(kp, H)
    bn = choose_block_n(H)  # -> 128 (H padded to one 128-wide tile)

    w_f32, bf32 = prepare_highway_params(w1, b1, w2, b2, block_n=bn, mxu_dtype=jnp.float32)
    out_f32 = jax.block_until_ready(highway(x, w_f32, bf32, block_n=bn))
    ref_f32 = highway_ref(x, w1, b1, w2, b2)
    assert out_f32.shape == (B, H)
    assert jnp.allclose(out_f32, ref_f32, atol=2e-3, rtol=2e-3), "f32 path mismatch"

    w_bf16, bbf16 = prepare_highway_params(w1, b1, w2, b2, block_n=bn, mxu_dtype=jnp.bfloat16)
    out_bf16 = jax.block_until_ready(highway(x, w_bf16, bbf16, block_n=bn))
    ref_bf16 = highway_ref_bf16(x, w1, b1, w2, b2)
    assert jnp.allclose(out_bf16, ref_bf16, atol=5e-3, rtol=5e-3), "bf16 path mismatch"

    # --- Test 2: tiled-N multi-step grid (B=16, H=256, block_n=128 -> nj=2, nb=2).
    k2x, k2p = jax.random.split(kp)
    B2, H2 = 16, 256
    x2 = jax.random.normal(k2x, (B2, H2), dtype=jnp.float32)
    w1b, b1b, w2b, b2b = make_params(k2p, H2)
    bn2 = 128

    # f32 path: exercises in-kernel residual slicing with j > 0.
    w_f2a, b_f2a = prepare_highway_params(w1b, b1b, w2b, b2b, block_n=bn2, mxu_dtype=jnp.float32)
    out2a = jax.block_until_ready(highway(x2, w_f2a, b_f2a, block_n=bn2, block_b=8))
    ref2a = highway_ref(x2, w1b, b1b, w2b, b2b)
    assert out2a.shape == (B2, H2)
    assert jnp.allclose(out2a, ref2a, atol=2e-3, rtol=2e-3), "tiled-N f32 path mismatch"

    # bf16 path: exercises the split (bf16 matmul stream + f32 residual) inputs.
    w_f2b, b_f2b = prepare_highway_params(w1b, b1b, w2b, b2b, block_n=bn2, mxu_dtype=jnp.bfloat16)
    out2b = jax.block_until_ready(highway(x2, w_f2b, b_f2b, block_n=bn2, block_b=8))
    ref2b = highway_ref_bf16(x2, w1b, b1b, w2b, b2b)
    assert jnp.allclose(out2b, ref2b, atol=5e-3, rtol=5e-3), "tiled-N bf16 path mismatch"

    # --- Test 3: ragged B and H (B=10, H=200) -> row pad to 16, col pad to 256, nj=2.
    k3x, k3p = jax.random.split(k2p)
    B3, H3 = 10, 200
    x3 = jax.random.normal(k3x, (B3, H3), dtype=jnp.float32)
    w1c, b1c, w2c, b2c = make_params(k3p, H3)
    bn3 = 128
    w_f3, b_f3 = prepare_highway_params(w1c, b1c, w2c, b2c, block_n=bn3, mxu_dtype=jnp.bfloat16)
    out3 = jax.block_until_ready(highway(x3, w_f3, b_f3, block_n=bn3))
    ref3 = highway_ref_bf16(x3, w1c, b1c, w2c, b2c)
    assert out3.shape == (B3, H3)
    assert jnp.allclose(out3, ref3, atol=5e-3, rtol=5e-3), "ragged/padded path mismatch"

    print("KERNEL_OK")
</pallas_src>

<mosaic_0001>
module attributes {stable_mosaic.version = 11 : i64} {
  func.func @_highway_kernel_shared_x(%arg0: i32, %arg1: i32, %arg2: memref<8x128xf32, #tpu.memory_space<vmem>>, %arg3: memref<128x256xf32, #tpu.memory_space<vmem>>, %arg4: memref<1x256xf32, #tpu.memory_space<vmem>>, %arg5: memref<8x128xf32, #tpu.memory_space<vmem>>) attributes {dimension_semantics = [#tpu.dimension_semantics<arbitrary>, #tpu.dimension_semantics<parallel>], iteration_bounds = array<i64: 1, 1>, scalar_prefetch = 0 : i64, scratch_operands = 0 : i64, tpu.core_type = #tpu.core_type<tc>, window_params = [{transform_indices = @transform_0, window_bounds = array<i64: 8, 128>}, {pipeline_mode = #tpu.pipeline_mode<synchronous>, transform_indices = @transform_1, window_bounds = array<i64: 128, 256>}, {pipeline_mode = #tpu.pipeline_mode<synchronous>, transform_indices = @transform_2, window_bounds = array<i64: 1, 256>}, {transform_indices = @transform_3, window_bounds = array<i64: 8, 128>}]} {
    %c128_i32 = arith.constant 128 : i32
    %0 = arith.muli %arg0, %c128_i32 : i32
    %1 = tpu.assume_multiple %0, 128 : i32
    %c0 = arith.constant 0 : index
    %c0_0 = arith.constant 0 : index
    %2 = vector.load %arg2[%c0, %c0_0] : memref<8x128xf32, #tpu.memory_space<vmem>>, vector<8x128xf32>
    %c0_1 = arith.constant 0 : index
    %3 = arith.index_cast %1 : i32 to index
    %4 = vector.load %arg2[%c0_1, %3] : memref<8x128xf32, #tpu.memory_space<vmem>>, vector<8x128xf32>
    %c0_2 = arith.constant 0 : index
    %c0_3 = arith.constant 0 : index
    %5 = vector.load %arg3[%c0_2, %c0_3] : memref<128x256xf32, #tpu.memory_space<vmem>>, vector<128x256xf32>
    %c0_4 = arith.constant 0 : index
    %c0_5 = arith.constant 0 : index
    %6 = vector.load %arg4[%c0_4, %c0_5] : memref<1x256xf32, #tpu.memory_space<vmem>>, vector<1x256xf32>
    %cst = arith.constant dense<0.000000e+00> : vector<8x256xf32>
    %7 = tpu.matmul %2, %5, %cst {dimension_numbers = #tpu.dot_dimension_numbers<[1], [0], [0], [1], [0, 0, 1, 1], [], []>} : vector<8x128xf32>, vector<128x256xf32>, vector<8x256xf32> -> vector<8x256xf32>
    %8 = vector.broadcast %6 : vector<1x256xf32> to vector<8x256xf32>
    %9 = arith.addf %7, %8 : vector<8x256xf32>
    %10 = vector.extract_strided_slice %9 {offsets = [0, 0], sizes = [8, 128], strides = [1, 1]} : vector<8x256xf32> to vector<8x128xf32>
    %11 = arith.negf %10 : vector<8x128xf32>
    %12 = math.exp %11 : vector<8x128xf32>
    %cst_6 = arith.constant 1.000000e+00 : f32
    %13 = vector.broadcast %cst_6 : f32 to vector<8x128xf32>
    %14 = arith.addf %13, %12 : vector<8x128xf32>
    %15 = arith.divf %13, %14 : vector<8x128xf32>
    %16 = vector.extract_strided_slice %9 {offsets = [0, 128], sizes = [8, 128], strides = [1, 1]} : vector<8x256xf32> to vector<8x128xf32>
    %cst_7 = arith.constant 0.000000e+00 : f32
    %17 = vector.broadcast %cst_7 : f32 to vector<8x128xf32>
    %18 = arith.maximumf %16, %17 : vector<8x128xf32>
    %19 = arith.subf %18, %4 : vector<8x128xf32>
    %20 = arith.mulf %15, %19 : vector<8x128xf32>
    %21 = arith.addf %4, %20 : vector<8x128xf32>
    %c0_8 = arith.constant 0 : index
    %c0_9 = arith.constant 0 : index
    %22 = vector.load %arg5[%c0_8, %c0_9] : memref<8x128xf32, #tpu.memory_space<vmem>>, vector<8x128xf32>
    tpu.vector_store %arg5[%c0_8, %c0_9], %21 {strides = array<i32>} : memref<8x128xf32, #tpu.memory_space<vmem>>, vector<8x128xf32>,
    return
  }
  func.func @transform_0(%arg0: i32, %arg1: i32) -> (i32, i32) {
    %c0_i32 = arith.constant 0 : i32
    %c0_i32_0 = arith.constant 0 : i32
    return %arg1, %c0_i32 : i32, i32
  }
  func.func @transform_1(%arg0: i32, %arg1: i32) -> (i32, i32) {
    %c0_i32 = arith.constant 0 : i32
    %c0_i32_0 = arith.constant 0 : i32
    return %c0_i32, %arg0 : i32, i32
  }
  func.func @transform_2(%arg0: i32, %arg1: i32) -> (i32, i32) {
    %c0_i32 = arith.constant 0 : i32
    %c0_i32_0 = arith.constant 0 : i32
    return %c0_i32, %arg0 : i32, i32
  }
  func.func @transform_3(%arg0: i32, %arg1: i32) -> (i32, i32) {
    %c0_i32 = arith.constant 0 : i32
    return %arg1, %arg0 : i32, i32
  }
}

</mosaic_0001>

<bundles_post_ra>
// kernel: tpu_custom_call.1
= control target key start
LH: loop header
LB: loop body
LE: loop exit
PB: predicated region body
PF: predicated region fallthrough
CT: control target
= control target key end

     0   :  { %8 = vsyncpa [#allocation3], 0  ;;  %s377_s0 = inlined_call_operand.hbm [shape: f32[8,128], index: 0, kind: input, shape index: {}]   ;;  %s378_s1 = inlined_call_operand.hbm [shape: f32[128,256], index: 1, kind: input, shape index: {}]   ;;  %s379_s2 = inlined_call_operand.vmem [shape: f32[1,256], index: 2, kind: input, shape index: {}]   ;;  %s380_s3 = inlined_call_operand.hbm [shape: f32[8,128], index: 3, kind: output, shape index: {}]  }
   0x1   :  { %9 = vsyncpa [#allocation6], 0 }
   0x2   :  { %10 = vsyncpa [#allocation4], 0  ;;  %s305_s12 = smov [#allocation2]   ;;  %s306_s14 = smov [#allocation5]  }
   0x3   :  { %s17_s13 = sshll.u32 %s305_s12, 4  ;;  %s26_s15 = sshll.u32 %s306_s14, 4  ;;  %s18_s13 = int_to_ptr.vmem [resolvable:$true] %s17_s13  ;;  %s331_s15 = int_to_ptr.vmem [resolvable:$true] %s26_s15 }
   0x4   :  { %s233_s18 = scalar_lea.hbm %s377_s0, 128 }
   0x5   :  { %p234_p0 = scmp.ne.s32.totalorder %s377_s0, %s233_s18  ;;  %p237_p1 = scmp.lt.u32.totalorder %s233_s18, %s377_s0 }
   0x7   :  { %p239_p2 = pnand %p237_p1, %p234_p0 }
   0x9   :  { %242 = shalt.err (!%p239_p2)
}
   0xa   :  { %s243_s23 = scalar_lea.vmem %s18_s13, 128  ;;  %p248_p4 = scmp.lt.s32.totalorder %s18_s13, %s18_s13 }
   0xb   :  { %p244_p3 = scmp.ne.s32.totalorder %s18_s13, %s243_s23  ;;  %p249_p5 = scmp.lt.s32.totalorder %s243_s23, %s243_s23 }
   0xd   :  { %p250_p6 = por %p249_p5, %p248_p4 }
   0xf   :  { %p251_p7 = pnand %p250_p6, %p244_p3 }
  0x11   :  { %254 = shalt.err (!%p251_p7)
}
  0x12   :  { %20 = dma.hbm_to_vmem [thread:$0]  %s377_s0, 128, %s18_s13, [#allocation3]  }
  0x13   :  { %s255_s28 = scalar_lea.hbm %s378_s1, 4096 }
  0x14   :  { %p256_p8 = scmp.ne.s32.totalorder %s378_s1, %s255_s28  ;;  %p259_p9 = scmp.lt.u32.totalorder %s255_s28, %s378_s1 }
  0x16   :  { %p261_p10 = pnand %p259_p9, %p256_p8 }
  0x18   :  { %264 = shalt.err (!%p261_p10)
}
  0x19   :  { %s265_s6 = scalar_lea.vmem %s331_s15, 4096  ;;  %p270_p12 = scmp.lt.s32.totalorder %s331_s15, %s331_s15 }
  0x1a   :  { %p266_p11 = scmp.ne.s32.totalorder %s331_s15, %s265_s6  ;;  %p271_p13 = scmp.lt.s32.totalorder %s265_s6, %s265_s6 }
  0x1c   :  { %p272_p0 = por %p271_p13, %p270_p12 }
  0x1e   :  { %p273_p1 = pnand %p272_p0, %p266_p11 }
  0x20   :  { %276 = shalt.err (!%p273_p1)
}
  0x21   :  { %s307_s0 = smov 256   ;;  %s308_s7 = smov 16  }
  0x22   :  { %32 = dma.hbm_to_vmem [thread:$0]  %s378_s1, 4096, %s331_s15, [#allocation6], %s307_s0, %s307_s0, %s308_s7  }
  0x23   :  { %299 = dma.done.wait [#allocation3], 128  }
  0x24   :  { %300 = vsyncadd [#allocation3], 4294967168 }
  0x25   :  { %301 = dma.done.wait [#allocation6], 4096  }
  0x26   :  { %302 = vsyncadd [#allocation6], 4294963200  ;;  %v309_v0 = vmov 0.0   ;;  %v48_v1 = vld [vmem:[#allocation5 + $0x8] sm:$0xff]  ;;  %v50_v2 = vld [vmem:[#allocation5 + $0x18] sm:$0xff]  ;;  %v81_v50 = vlaneseq  ;;  %s310_s11 = smov [#allocation7]  }
  0x27   :  { %155 = vmatprep.mubr.f32.mxu0 %v309_v0  ;;  %v47_v3 = vld [vmem:[#allocation5] sm:$0xff]  ;;  %v191_v4 = vpack.c.bf16 %v50_v2, %v48_v1  ;;  %v49_v5 = vld [vmem:[#allocation5 + $0x10] sm:$0xff]  ;;  %v52_v6 = vld [vmem:[#allocation5 + $0x28] sm:$0xff]  ;;  %s179_s12 = sshll.u32 %s310_s11, 4  ;;  %s180_s12 = int_to_ptr.vmem [resolvable:$true] %s179_s12 }
  0x28   :  { %v54_v7 = vld [vmem:[#allocation5 + $0x38] sm:$0xff]  ;;  %v193_v8 = vpack.c.bf16 %v49_v5, %v47_v3  ;;  %v51_v10 = vld [vmem:[#allocation5 + $0x20] sm:$0xff]  ;;  %v53_v11 = vld [vmem:[#allocation5 + $0x30] sm:$0xff]  ;;  %v82_v51 = vshrl.u32 %v81_v50, 7  ;;  %p282_p3 = scmp.lt.s32.totalorder %s180_s12, %s180_s12 }
  0x29   :  { %v195_v9 = vpack.c.bf16 %v54_v7, %v52_v6  ;;  %v56_v12 = vld [vmem:[#allocation5 + $0x48] sm:$0xff]  ;;  %192 = vmatprep.subr.bf16.mxu0 %v191_v4  ;;  %v58_v13 = vld [vmem:[#allocation5 + $0x58] sm:$0xff]  ;;  %v197_v14 = vpack.c.bf16 %v53_v11, %v51_v10  ;;  %v55_v16 = vld [vmem:[#allocation5 + $0x40] sm:$0xff] }
  0x2a   :  { %194 = vmatpush1.bf16.msra.mxu0 %v193_v8  ;;  %v199_v15 = vpack.c.bf16 %v58_v13, %v56_v12  ;;  %v57_v17 = vld [vmem:[#allocation5 + $0x50] sm:$0xff]  ;;  %v60_v18 = vld [vmem:[#allocation5 + $0x68] sm:$0xff]  ;;  %v62_v19 = vld [vmem:[#allocation5 + $0x78] sm:$0xff]  ;;  %v83_v52 = vsub.s32 0, %v82_v51  ;;  %v87_v59 = vsub.s32 1, %v82_v51 }
  0x2b   :  { %196 = vmatprep.subr.bf16.mxu0 %v195_v9  ;;  %v201_v20 = vpack.c.bf16 %v57_v17, %v55_v16  ;;  %v203_v21 = vpack.c.bf16 %v62_v19, %v60_v18  ;;  %v59_v22 = vld [vmem:[#allocation5 + $0x60] sm:$0xff]  ;;  %v61_v23 = vld [vmem:[#allocation5 + $0x70] sm:$0xff]  ;;  %v64_v24 = vld [vmem:[#allocation5 + $0x88] sm:$0xff] }
  0x2c   :  { %v66_v25 = vld [vmem:[#allocation5 + $0x98] sm:$0xff]  ;;  %v205_v26 = vpack.c.bf16 %v61_v23, %v59_v22  ;;  %v63_v28 = vld [vmem:[#allocation5 + $0x80] sm:$0xff]  ;;  %v65_v29 = vld [vmem:[#allocation5 + $0x90] sm:$0xff] }
  0x2d   :  { %v207_v27 = vpack.c.bf16 %v66_v25, %v64_v24  ;;  %v68_v30 = vld [vmem:[#allocation5 + $0xa8] sm:$0xff]  ;;  %v70_v31 = vld [vmem:[#allocation5 + $0xb8] sm:$0xff]  ;;  %v209_v32 = vpack.c.bf16 %v65_v29, %v63_v28  ;;  %v67_v34 = vld [vmem:[#allocation5 + $0xa0] sm:$0xff] }
  0x2e   :  { %198 = vmatpush1.bf16.msra.mxu0 %v197_v14  ;;  %v211_v33 = vpack.c.bf16 %v70_v31, %v68_v30  ;;  %v69_v35 = vld [vmem:[#allocation5 + $0xb0] sm:$0xff]  ;;  %v72_v36 = vld [vmem:[#allocation5 + $0xc8] sm:$0xff]  ;;  %v74_v37 = vld [vmem:[#allocation5 + $0xd8] sm:$0xff] }
  0x2f   :  { %200 = vmatprep.subr.bf16.mxu0 %v199_v15  ;;  %v213_v38 = vpack.c.bf16 %v69_v35, %v67_v34  ;;  %v215_v39 = vpack.c.bf16 %v74_v37, %v72_v36  ;;  %v71_v40 = vld [vmem:[#allocation5 + $0xc0] sm:$0xff]  ;;  %v73_v41 = vld [vmem:[#allocation5 + $0xd0] sm:$0xff]  ;;  %v76_v42 = vld [vmem:[#allocation5 + $0xe8] sm:$0xff] }
  0x30   :  { %v78_v43 = vld [vmem:[#allocation5 + $0xf8] sm:$0xff]  ;;  %v217_v44 = vpack.c.bf16 %v73_v41, %v71_v40  ;;  %v75_v46 = vld [vmem:[#allocation5 + $0xe0] sm:$0xff]  ;;  %v77_v47 = vld [vmem:[#allocation5 + $0xf0] sm:$0xff] }
  0x31   :  { %v219_v45 = vpack.c.bf16 %v78_v43, %v76_v42  ;;  %v221_v48 = vpack.c.bf16 %v77_v47, %v75_v46  ;;  %v42_v49 = vld [vmem:[#allocation2] sm:$0xff] }
  0x32   :  { %202 = vmatpush1.bf16.msra.mxu0 %v201_v20  ;;  %v79_v53 = vld [vmem:[%s379_s2] sm:$0x3]  ;;  %s277_s2 = scalar_lea.vmem %s180_s12, 128 }
  0x33   :  { %204 = vmatprep.subr.bf16.mxu0 %v203_v21  ;;  %v84_v54 = vrot.slane %v79_v53, %v83_v52  ;;  %v88_v61 = vrot.slane %v79_v53, %v87_v59  ;;  %p278_p2 = scmp.ne.s32.totalorder %s180_s12, %s277_s2  ;;  %p283_p4 = scmp.lt.s32.totalorder %s277_s2, %s277_s2 }
  0x35   :  { %p284_p5 = por %p283_p4, %p282_p3 }
  0x36   :  { %206 = vmatpush1.bf16.msra.mxu0 %v205_v26 }
  0x37   :  { %208 = vmatprep.subr.bf16.mxu0 %v207_v27  ;;  %p285_p6 = pnand %p284_p5, %p278_p2 }
  0x3a   :  { %210 = vmatpush1.bf16.msra.mxu0 %v209_v32 }
  0x3b   :  { %212 = vmatprep.subr.bf16.mxu0 %v211_v33 }
  0x3e   :  { %214 = vmatpush1.bf16.msra.mxu0 %v213_v38 }
  0x3f   :  { %216 = vmatprep.subr.bf16.mxu0 %v215_v39 }
  0x42   :  { %218 = vmatpush1.bf16.msra.mxu0 %v217_v44 }
  0x43   :  { %220 = vmatprep.subr.bf16.mxu0 %v219_v45 }
  0x46   :  { %222 = vmatpush1.bf16.msra.mxu0 %v221_v48 }
  0x49   :  { %156 = vmatmul.mubr.f32.vlgmr.msra.gmra.mrb[0].mxu0 %v42_v49 }
 0x11c   :  { %v157_v55 = vpop.f32.mrb[0].mxu0 }
 0x11d   :  { %v158_v56 = vadd.f32 %v157_v55, %v84_v54  ;;  %v159_v57 = vpop.f32.mrb[1].mxu0 }
 0x11e   :  { %v160_v63 = vadd.f32 %v159_v57, %v88_v61 }
 0x11f   :  { %v190_v58 = vmul.f32 -1.442695, %v158_v56 }
 0x120   :  { %v168_v0 = vmax.f32 %v160_v63, 0.0 }
 0x121   :  { %229 = vpow2.f32 %v190_v58 }
 0x122   :  { %v169_v1 = vsub.f32 %v168_v0, %v42_v49 }
 0x12b   :  { %v230_v60 = vpop.eup %229 }
 0x12c   :  { %v165_v62 = vadd.f32 1.0, %v230_v60 }
 0x12e   :  { %231 = vrcp.f32 %v165_v62 }
 0x138   :  { %v232_v2 = vpop.eup %231 }
 0x139   :  { %v170_v3 = vmul.f32 %v232_v2, %v169_v1 }
 0x13b   :  { %v171_v4 = vadd.f32 %v170_v3, %v42_v49 }
 0x13d   :  { %172 = vst [vmem:[#allocation7] sm:$0xff] %v171_v4 }
 0x13e   :  { %288 = shalt.err (!%p285_p6)
}
 0x13f   :  { %s289_s15 = scalar_lea.hbm %s380_s3, 128 }
 0x140   :  { %p290_p7 = scmp.ne.s32.totalorder %s380_s3, %s289_s15  ;;  %p293_p8 = scmp.lt.u32.totalorder %s289_s15, %s380_s3 }
 0x142   :  { %p295_p9 = pnand %p293_p8, %p290_p7 }
 0x144   :  { %298 = shalt.err (!%p295_p9)
}
 0x145   :  { %182 = dma.vmem_to_hbm [thread:$0]  %s180_s12, 128, %s380_s3, [#allocation4]  }
 0x146   :  { %303 = dma.done.wait [#allocation4], 128  }
 0x147   :  { %304 = vsyncadd [#allocation4], 4294967168 }
 0x148   :  { %186 = vsyncpa [#allocation3], 1 }
 0x149   :  { %187 = vsyncpa [#allocation6], 1 }
 0x14a   :  { %188 = vsyncpa [#allocation4], 1 }

</bundles_post_ra>
